<compile_context>
chip_gen: v7x
topology: tpu7x:2x2x1
jax: 0.10.0
libtpu: 0.0.40
codegen_flags: <defaults>
</compile_context>

<pallas_src>
import functools
from typing import NamedTuple, Tuple

import jax
import jax.numpy as jnp
from jax.experimental import pallas as pl
from jax.experimental.pallas import tpu as pltpu

LANE = 128
SUBLANE = 8


class PackedMeta(NamedTuple):
    dims: Tuple[int, ...]    # true feature sizes  [D_in, 10, 100, D_out]
    pdims: Tuple[int, ...]   # lane-padded feature sizes (multiples of 128)
    tn: int                  # output-feature tile of the last layer


def _round_up(v, m):
    return (v + m - 1) // m * m


def _pick_divisor_tile(total, max_tile, align=LANE):
    """Largest multiple of `align` that divides `total` and is <= max_tile."""
    best = align
    t = align
    while t <= min(max_tile, total):
        if total % t == 0:
            best = t
        t += align
    return best


# --------------------------- one-time param packing ------------------------- #

def pack_decoder_params(params, input_size, weight_dtype=jnp.bfloat16, max_tn=512):
    """Pack once, reuse across every forward call.

    Weights are transposed to (in, out), zero-padded to lane-dense shapes and cast
    to `weight_dtype` (bf16 by default).  Biases stay f32 (epilogue is f32).
    Zero padding is mathematically exact through matmul/bias/ReLU.
    """
    dims = [int(input_size)] + [int(w.shape[0]) for (w, _) in params]
    pdims = [_round_up(d, LANE) for d in dims]
    tn = _pick_divisor_tile(pdims[-1], max_tn)

    packed = []
    for li, (w, b) in enumerate(params):
        out_d, in_d = w.shape
        wp = jnp.zeros((pdims[li], pdims[li + 1]), weight_dtype)
        wp = wp.at[:in_d, :out_d].set(jnp.transpose(w).astype(weight_dtype))
        bp = jnp.zeros((1, pdims[li + 1]), jnp.float32)
        bp = bp.at[0, :out_d].set(b.astype(jnp.float32))
        packed += [wp, bp]
    return tuple(packed), PackedMeta(tuple(dims), tuple(pdims), tn)


# ------------------------------- Pallas kernel ------------------------------ #

def make_decoder_kernel(num_layers):
    """Fused MLP kernel.

    Ref order: x_ref, (w_ref, b_ref) * num_layers, out_ref
      x_ref : (TB, D0p)           f32 padded batch tile
      w_ref : (D_i_p, D_{i+1}_p)  bf16, (in, out); last layer is an N-tile (D_{L-1}_p, TN)
      b_ref : (1, D_{i+1}_p)      f32; last layer is (1, TN)
      out   : (TB, TN)            f32
    """

    def kernel(*refs):
        x_ref = refs[0]
        out_ref = refs[-1]
        wb = refs[1:-1]

        h = x_ref[...]                                        # (TB, D0p) f32
        for i in range(num_layers):
            w = wb[2 * i][...]                                # bf16
            b = wb[2 * i + 1][...]                            # f32
            # bf16 MXU matmul, f32 accumulation; bias add + ReLU in f32 on the VPU.
            h = jnp.dot(h.astype(w.dtype), w,
                        preferred_element_type=jnp.float32) + b
            if i != num_layers - 1:
                # Dropout is identity at inference time.
                h = jnp.maximum(h, 0.0)
        out_ref[...] = h.astype(out_ref.dtype)

    return kernel


def _resident_spec(block_shape, index_map, single_buffer):
    """BlockSpec for a constant-index (VMEM-resident) operand.

    Uses pl.Buffered(1) to avoid wasting a second VMEM buffer on data that is never
    re-fetched; falls back to the default spec if pipeline_mode is unsupported.
    """
    if single_buffer:
        try:
            return pl.BlockSpec(block_shape, index_map,
                                pipeline_mode=pl.Buffered(1))
        except Exception:
            pass
    return pl.BlockSpec(block_shape, index_map)


def _vmem_limit_bytes(tb, tn, pdims, wbytes, single_buffer):
    """Explicit scoped-VMEM budget derived from the actual tile plan (+headroom)."""
    nbuf = 1 if single_buffer else 2
    nl = len(pdims) - 1
    need = tb * pdims[0] * 4 * 2                       # x tile (double buffered)
    for i in range(nl - 1):
        need += pdims[i] * pdims[i + 1] * wbytes * nbuf    # resident hidden weights
        need += pdims[i + 1] * 4 * nbuf                    # resident hidden biases
    need += pdims[-2] * tn * wbytes * 2                # streamed last-layer weight tile
    need += tn * 4 * 2                                 # streamed last-layer bias tile
    need += tb * tn * 4 * 2                            # out tile
    need += tb * max(pdims) * 4 * 4                    # activation headroom
    # >=16 MiB for pipelining slack, <=64 MiB so the plan also fits v7x physical VMEM.
    return int(min(max(2 * need, 16 << 20), 64 << 20))


# ---------------------------------- wrapper --------------------------------- #

@functools.partial(jax.jit, static_argnames=("meta", "single_buffer_weights"))
def decoder_forward(x, packed, meta, single_buffer_weights=True):
    """Equivalent of DecoderModule.forward (eval mode) on pre-packed params."""
    dims, pdims, tn = meta.dims, meta.pdims, meta.tn
    num_layers = len(dims) - 1

    x = x.astype(jnp.float32)
    B, d_in = x.shape

    # 256-tall batch tile matches the v6e/v7x MXU; harmless (==B) at small batch.
    tb = min(256, _round_up(B, SUBLANE))
    bp = _round_up(B, tb)

    # Skip the extra padded HBM copy of x when it is already tile/lane aligned.
    if bp == B and pdims[0] == d_in:
        xp = x
    else:
        xp = jnp.zeros((bp, pdims[0]), jnp.float32).at[:B, :d_in].set(x)

    # grid = (j over last-layer output-feature tiles, i over batch tiles).
    # j is the OUTER axis so the (potentially huge) last-layer weight is streamed
    # exactly once and reused across all batch tiles; the small x tile is the one
    # that gets re-fetched.  Both axes are independent -> "parallel" (megacore).
    grid = (pdims[-1] // tn, bp // tb)

    in_specs = [pl.BlockSpec((tb, pdims[0]), lambda j, i: (i, 0))]
    for li in range(num_layers - 1):
        # Hidden weights/biases: constant index map -> DMA'd once, VMEM-resident.
        in_specs.append(_resident_spec((pdims[li], pdims[li + 1]),
                                       lambda j, i: (0, 0), single_buffer_weights))
        in_specs.append(_resident_spec((1, pdims[li + 1]),
                                       lambda j, i: (0, 0), single_buffer_weights))
    # Last layer: output features tiled along grid axis j; default double buffering
    # so the next weight tile's DMA overlaps the current tile's matmul.
    in_specs.append(pl.BlockSpec((pdims[-2], tn), lambda j, i: (0, j)))
    in_specs.append(pl.BlockSpec((1, tn), lambda j, i: (0, j)))

    out_spec = pl.BlockSpec((tb, tn), lambda j, i: (i, j))

    wbytes = jnp.dtype(packed[0].dtype).itemsize
    flops = 2 * B * sum(dims[i] * dims[i + 1] for i in range(num_layers))
    bytes_accessed = (B * d_in * 4 + B * dims[-1] * 4 +
                      sum(int(a.size) * jnp.dtype(a.dtype).itemsize for a in packed))

    out_padded = pl.pallas_call(
        make_decoder_kernel(num_layers),
        out_shape=jax.ShapeDtypeStruct((bp, pdims[-1]), jnp.float32),
        grid_spec=pltpu.PrefetchScalarGridSpec(
            num_scalar_prefetch=0,
            grid=grid,
            in_specs=in_specs,
            out_specs=out_spec,
        ),
        compiler_params=pltpu.CompilerParams(
            dimension_semantics=("parallel", "parallel"),
            vmem_limit_bytes=_vmem_limit_bytes(tb, tn, pdims, wbytes,
                                               single_buffer_weights)),
        cost_estimate=pl.CostEstimate(flops=flops, transcendentals=0,
                                      bytes_accessed=bytes_accessed),
    )(xp, *packed)

    if bp == B and pdims[-1] == dims[-1]:
        return out_padded
    return out_padded[:B, :dims[-1]]


# ------------------------------ parameter init ------------------------------ #

def init_decoder_params(key, input_size, output_size, decoder_sizes=(10, 100)):
    """Matches torch.nn.Linear default init: U(-1/sqrt(fan_in), 1/sqrt(fan_in))."""
    sizes = [input_size] + list(decoder_sizes) + [output_size]
    params = []
    for i in range(len(sizes) - 1):
        fan_in, fan_out = sizes[i], sizes[i + 1]
        bound = 1.0 / jnp.sqrt(jnp.float32(fan_in))
        key, kw, kb = jax.random.split(key, 3)
        w = jax.random.uniform(kw, (fan_out, fan_in), jnp.float32, -bound, bound)
        b = jax.random.uniform(kb, (fan_out,), jnp.float32, -bound, bound)
        params.append((w, b))
    return params


# ---------------------------- pure-JAX reference ----------------------------- #

def decoder_reference(x, params):
    h = x.astype(jnp.float32)
    n = len(params)
    for i, (w, b) in enumerate(params):
        h = h @ w.T.astype(jnp.float32) + b.astype(jnp.float32)
        if i != n - 1:
            # Dropout = identity in eval mode.
            h = jnp.maximum(h, 0.0)
    return h


# ------------------------------------ main ----------------------------------- #

if __name__ == "__main__":
    # Small shapes consistent with DecoderModule: x is (batch, input_size).
    batch, input_size, output_size = 8, 32, 64
    decoder_sizes = (10, 100)                      # module default [10, 100]

    key = jax.random.PRNGKey(0)
    k_x, k_p = jax.random.split(key)
    x = jax.random.normal(k_x, (batch, input_size), jnp.float32)
    params = init_decoder_params(k_p, input_size, output_size, decoder_sizes)

    # TODO(synk): nn.Dropout is applied as identity (inference mode); stochastic
    # training-mode masking with PyTorch-matching RNG is not reproduced.

    # Pack weights ONCE (transpose + pad + bf16 cast), reused by every forward call.
    packed, meta = pack_decoder_params(params, input_size)

    ref = decoder_reference(x, params)

    def _run(single_buffer):
        out = decoder_forward(x, packed, meta=meta,
                              single_buffer_weights=single_buffer)
        return jax.block_until_ready(out)

    # Prefer single-buffered resident weights; fall back to default buffering if the
    # installed jax rejects (or mishandles) pipeline_mode on this TPU generation.
    ok = False
    out = None
    try:
        out = _run(True)
        ok = (out.shape == (batch, output_size) and
              bool(jnp.allclose(out, ref, atol=3e-2, rtol=3e-2)))
    except Exception:
        ok = False
    if not ok:
        out = _run(False)

    assert out.shape == (batch, output_size), out.shape
    # bf16 weights / bf16 activations into the MXU with f32 accumulation -> compare
    # against the f32 reference with a correspondingly loosened tolerance.
    assert jnp.allclose(out, ref, atol=3e-2, rtol=3e-2), "mismatch vs reference"

    print("KERNEL_OK")
</pallas_src>

<mosaic_0001>
module attributes {stable_mosaic.version = 11 : i64} {
  func.func @kernel(%arg0: i32, %arg1: i32, %arg2: memref<8x128xf32, #tpu.memory_space<vmem>>, %arg3: memref<128x128xbf16, #tpu.memory_space<vmem>>, %arg4: memref<1x128xf32, #tpu.memory_space<vmem>>, %arg5: memref<128x128xbf16, #tpu.memory_space<vmem>>, %arg6: memref<1x128xf32, #tpu.memory_space<vmem>>, %arg7: memref<128x128xbf16, #tpu.memory_space<vmem>>, %arg8: memref<1x128xf32, #tpu.memory_space<vmem>>, %arg9: memref<8x128xf32, #tpu.memory_space<vmem>>) attributes {dimension_semantics = [#tpu.dimension_semantics<parallel>, #tpu.dimension_semantics<parallel>], iteration_bounds = array<i64: 1, 1>, scalar_prefetch = 0 : i64, scratch_operands = 0 : i64, tpu.core_type = #tpu.core_type<tc>, window_params = [{transform_indices = @transform_0, window_bounds = array<i64: 8, 128>}, {pipeline_mode = #tpu.pipeline_mode<synchronous>, transform_indices = @transform_1, window_bounds = array<i64: 128, 128>}, {pipeline_mode = #tpu.pipeline_mode<synchronous>, transform_indices = @transform_2, window_bounds = array<i64: 1, 128>}, {pipeline_mode = #tpu.pipeline_mode<synchronous>, transform_indices = @transform_3, window_bounds = array<i64: 128, 128>}, {pipeline_mode = #tpu.pipeline_mode<synchronous>, transform_indices = @transform_4, window_bounds = array<i64: 1, 128>}, {transform_indices = @transform_5, window_bounds = array<i64: 128, 128>}, {transform_indices = @transform_6, window_bounds = array<i64: 1, 128>}, {transform_indices = @transform_7, window_bounds = array<i64: 8, 128>}]} {
    %c0 = arith.constant 0 : index
    %c0_0 = arith.constant 0 : index
    %0 = vector.load %arg2[%c0, %c0_0] : memref<8x128xf32, #tpu.memory_space<vmem>>, vector<8x128xf32>
    %c0_1 = arith.constant 0 : index
    %c0_2 = arith.constant 0 : index
    %1 = vector.load %arg3[%c0_1, %c0_2] : memref<128x128xbf16, #tpu.memory_space<vmem>>, vector<128x128xbf16>
    %c0_3 = arith.constant 0 : index
    %c0_4 = arith.constant 0 : index
    %2 = vector.load %arg4[%c0_3, %c0_4] : memref<1x128xf32, #tpu.memory_space<vmem>>, vector<1x128xf32>
    %3 = arith.truncf %0 : vector<8x128xf32> to vector<8x128xbf16>
    %cst = arith.constant dense<0.000000e+00> : vector<8x128xf32>
    %4 = tpu.matmul %3, %1, %cst {dimension_numbers = #tpu.dot_dimension_numbers<[1], [0], [0], [1], [0, 0, 1, 1], [], []>} : vector<8x128xbf16>, vector<128x128xbf16>, vector<8x128xf32> -> vector<8x128xf32>
    %5 = vector.broadcast %2 : vector<1x128xf32> to vector<8x128xf32>
    %6 = arith.addf %4, %5 : vector<8x128xf32>
    %cst_5 = arith.constant 0.000000e+00 : f32
    %7 = vector.broadcast %cst_5 : f32 to vector<8x128xf32>
    %8 = arith.maximumf %6, %7 : vector<8x128xf32>
    %c0_6 = arith.constant 0 : index
    %c0_7 = arith.constant 0 : index
    %9 = vector.load %arg5[%c0_6, %c0_7] : memref<128x128xbf16, #tpu.memory_space<vmem>>, vector<128x128xbf16>
    %c0_8 = arith.constant 0 : index
    %c0_9 = arith.constant 0 : index
    %10 = vector.load %arg6[%c0_8, %c0_9] : memref<1x128xf32, #tpu.memory_space<vmem>>, vector<1x128xf32>
    %11 = arith.truncf %8 : vector<8x128xf32> to vector<8x128xbf16>
    %cst_10 = arith.constant dense<0.000000e+00> : vector<8x128xf32>
    %12 = tpu.matmul %11, %9, %cst_10 {dimension_numbers = #tpu.dot_dimension_numbers<[1], [0], [0], [1], [0, 0, 1, 1], [], []>} : vector<8x128xbf16>, vector<128x128xbf16>, vector<8x128xf32> -> vector<8x128xf32>
    %13 = vector.broadcast %10 : vector<1x128xf32> to vector<8x128xf32>
    %14 = arith.addf %12, %13 : vector<8x128xf32>
    %cst_11 = arith.constant 0.000000e+00 : f32
    %15 = vector.broadcast %cst_11 : f32 to vector<8x128xf32>
    %16 = arith.maximumf %14, %15 : vector<8x128xf32>
    %c0_12 = arith.constant 0 : index
    %c0_13 = arith.constant 0 : index
    %17 = vector.load %arg7[%c0_12, %c0_13] : memref<128x128xbf16, #tpu.memory_space<vmem>>, vector<128x128xbf16>
    %c0_14 = arith.constant 0 : index
    %c0_15 = arith.constant 0 : index
    %18 = vector.load %arg8[%c0_14, %c0_15] : memref<1x128xf32, #tpu.memory_space<vmem>>, vector<1x128xf32>
    %19 = arith.truncf %16 : vector<8x128xf32> to vector<8x128xbf16>
    %cst_16 = arith.constant dense<0.000000e+00> : vector<8x128xf32>
    %20 = tpu.matmul %19, %17, %cst_16 {dimension_numbers = #tpu.dot_dimension_numbers<[1], [0], [0], [1], [0, 0, 1, 1], [], []>} : vector<8x128xbf16>, vector<128x128xbf16>, vector<8x128xf32> -> vector<8x128xf32>
    %21 = vector.broadcast %18 : vector<1x128xf32> to vector<8x128xf32>
    %22 = arith.addf %20, %21 : vector<8x128xf32>
    %c0_17 = arith.constant 0 : index
    %c0_18 = arith.constant 0 : index
    %23 = vector.load %arg9[%c0_17, %c0_18] : memref<8x128xf32, #tpu.memory_space<vmem>>, vector<8x128xf32>
    tpu.vector_store %arg9[%c0_17, %c0_18], %22 {strides = array<i32>} : memref<8x128xf32, #tpu.memory_space<vmem>>, vector<8x128xf32>,
    return
  }
  func.func @transform_0(%arg0: i32, %arg1: i32) -> (i32, i32) {
    %c0_i32 = arith.constant 0 : i32
    %c0_i32_0 = arith.constant 0 : i32
    return %arg1, %c0_i32 : i32, i32
  }
  func.func @transform_1(%arg0: i32, %arg1: i32) -> (i32, i32) {
    %c0_i32 = arith.constant 0 : i32
    %c0_i32_0 = arith.constant 0 : i32
    %c0_i32_1 = arith.constant 0 : i32
    return %c0_i32, %c0_i32_0 : i32, i32
  }
  func.func @transform_2(%arg0: i32, %arg1: i32) -> (i32, i32) {
    %c0_i32 = arith.constant 0 : i32
    %c0_i32_0 = arith.constant 0 : i32
    %c0_i32_1 = arith.constant 0 : i32
    return %c0_i32, %c0_i32_0 : i32, i32
  }
  func.func @transform_3(%arg0: i32, %arg1: i32) -> (i32, i32) {
    %c0_i32 = arith.constant 0 : i32
    %c0_i32_0 = arith.constant 0 : i32
    %c0_i32_1 = arith.constant 0 : i32
    return %c0_i32, %c0_i32_0 : i32, i32
  }
  func.func @transform_4(%arg0: i32, %arg1: i32) -> (i32, i32) {
    %c0_i32 = arith.constant 0 : i32
    %c0_i32_0 = arith.constant 0 : i32
    %c0_i32_1 = arith.constant 0 : i32
    return %c0_i32, %c0_i32_0 : i32, i32
  }
  func.func @transform_5(%arg0: i32, %arg1: i32) -> (i32, i32) {
    %c0_i32 = arith.constant 0 : i32
    %c0_i32_0 = arith.constant 0 : i32
    return %c0_i32, %arg0 : i32, i32
  }
  func.func @transform_6(%arg0: i32, %arg1: i32) -> (i32, i32) {
    %c0_i32 = arith.constant 0 : i32
    %c0_i32_0 = arith.constant 0 : i32
    return %c0_i32, %arg0 : i32, i32
  }
  func.func @transform_7(%arg0: i32, %arg1: i32) -> (i32, i32) {
    %c0_i32 = arith.constant 0 : i32
    return %arg1, %arg0 : i32, i32
  }
}

module attributes {stable_mosaic.version = 11 : i64} {
  func.func @kernel(%arg0: i32, %arg1: i32, %arg2: memref<8x128xf32, #tpu.memory_space<vmem>>, %arg3: memref<128x128xbf16, #tpu.memory_space<vmem>>, %arg4: memref<1x128xf32, #tpu.memory_space<vmem>>, %arg5: memref<128x128xbf16, #tpu.memory_space<vmem>>, %arg6: memref<1x128xf32, #tpu.memory_space<vmem>>, %arg7: memref<128x128xbf16, #tpu.memory_space<vmem>>, %arg8: memref<1x128xf32, #tpu.memory_space<vmem>>, %arg9: memref<8x128xf32, #tpu.memory_space<vmem>>) attributes {dimension_semantics = [#tpu.dimension_semantics<parallel>, #tpu.dimension_semantics<parallel>], iteration_bounds = array<i64: 1, 1>, scalar_prefetch = 0 : i64, scratch_operands = 0 : i64, tpu.core_type = #tpu.core_type<tc>, window_params = [{transform_indices = @transform_0, window_bounds = array<i64: 8, 128>}, {pipeline_mode = #tpu.pipeline_mode<synchronous>, transform_indices = @transform_1, window_bounds = array<i64: 128, 128>}, {pipeline_mode = #tpu.pipeline_mode<synchronous>, transform_indices = @transform_2, window_bounds = array<i64: 1, 128>}, {pipeline_mode = #tpu.pipeline_mode<synchronous>, transform_indices = @transform_3, window_bounds = array<i64: 128, 128>}, {pipeline_mode = #tpu.pipeline_mode<synchronous>, transform_indices = @transform_4, window_bounds = array<i64: 1, 128>}, {transform_indices = @transform_5, window_bounds = array<i64: 128, 128>}, {transform_indices = @transform_6, window_bounds = array<i64: 1, 128>}, {transform_indices = @transform_7, window_bounds = array<i64: 8, 128>}]} {
    %c0 = arith.constant 0 : index
    %c0_0 = arith.constant 0 : index
    %0 = vector.load %arg2[%c0, %c0_0] : memref<8x128xf32, #tpu.memory_space<vmem>>, vector<8x128xf32>
    %c0_1 = arith.constant 0 : index
    %c0_2 = arith.constant 0 : index
    %1 = vector.load %arg3[%c0_1, %c0_2] : memref<128x128xbf16, #tpu.memory_space<vmem>>, vector<128x128xbf16>
    %c0_3 = arith.constant 0 : index
    %c0_4 = arith.constant 0 : index
    %2 = vector.load %arg4[%c0_3, %c0_4] : memref<1x128xf32, #tpu.memory_space<vmem>>, vector<1x128xf32>
    %3 = arith.truncf %0 : vector<8x128xf32> to vector<8x128xbf16>
    %cst = arith.constant dense<0.000000e+00> : vector<8x128xf32>
    %4 = tpu.matmul %3, %1, %cst {dimension_numbers = #tpu.dot_dimension_numbers<[1], [0], [0], [1], [0, 0, 1, 1], [], []>} : vector<8x128xbf16>, vector<128x128xbf16>, vector<8x128xf32> -> vector<8x128xf32>
    %5 = vector.broadcast %2 : vector<1x128xf32> to vector<8x128xf32>
    %6 = arith.addf %4, %5 : vector<8x128xf32>
    %cst_5 = arith.constant 0.000000e+00 : f32
    %7 = vector.broadcast %cst_5 : f32 to vector<8x128xf32>
    %8 = arith.maximumf %6, %7 : vector<8x128xf32>
    %c0_6 = arith.constant 0 : index
    %c0_7 = arith.constant 0 : index
    %9 = vector.load %arg5[%c0_6, %c0_7] : memref<128x128xbf16, #tpu.memory_space<vmem>>, vector<128x128xbf16>
    %c0_8 = arith.constant 0 : index
    %c0_9 = arith.constant 0 : index
    %10 = vector.load %arg6[%c0_8, %c0_9] : memref<1x128xf32, #tpu.memory_space<vmem>>, vector<1x128xf32>
    %11 = arith.truncf %8 : vector<8x128xf32> to vector<8x128xbf16>
    %cst_10 = arith.constant dense<0.000000e+00> : vector<8x128xf32>
    %12 = tpu.matmul %11, %9, %cst_10 {dimension_numbers = #tpu.dot_dimension_numbers<[1], [0], [0], [1], [0, 0, 1, 1], [], []>} : vector<8x128xbf16>, vector<128x128xbf16>, vector<8x128xf32> -> vector<8x128xf32>
    %13 = vector.broadcast %10 : vector<1x128xf32> to vector<8x128xf32>
    %14 = arith.addf %12, %13 : vector<8x128xf32>
    %cst_11 = arith.constant 0.000000e+00 : f32
    %15 = vector.broadcast %cst_11 : f32 to vector<8x128xf32>
    %16 = arith.maximumf %14, %15 : vector<8x128xf32>
    %c0_12 = arith.constant 0 : index
    %c0_13 = arith.constant 0 : index
    %17 = vector.load %arg7[%c0_12, %c0_13] : memref<128x128xbf16, #tpu.memory_space<vmem>>, vector<128x128xbf16>
    %c0_14 = arith.constant 0 : index
    %c0_15 = arith.constant 0 : index
    %18 = vector.load %arg8[%c0_14, %c0_15] : memref<1x128xf32, #tpu.memory_space<vmem>>, vector<1x128xf32>
    %19 = arith.truncf %16 : vector<8x128xf32> to vector<8x128xbf16>
    %cst_16 = arith.constant dense<0.000000e+00> : vector<8x128xf32>
    %20 = tpu.matmul %19, %17, %cst_16 {dimension_numbers = #tpu.dot_dimension_numbers<[1], [0], [0], [1], [0, 0, 1, 1], [], []>} : vector<8x128xbf16>, vector<128x128xbf16>, vector<8x128xf32> -> vector<8x128xf32>
    %21 = vector.broadcast %18 : vector<1x128xf32> to vector<8x128xf32>
    %22 = arith.addf %20, %21 : vector<8x128xf32>
    %c0_17 = arith.constant 0 : index
    %c0_18 = arith.constant 0 : index
    %23 = vector.load %arg9[%c0_17, %c0_18] : memref<8x128xf32, #tpu.memory_space<vmem>>, vector<8x128xf32>
    tpu.vector_store %arg9[%c0_17, %c0_18], %22 {strides = array<i32>} : memref<8x128xf32, #tpu.memory_space<vmem>>, vector<8x128xf32>,
    return
  }
  func.func @transform_0(%arg0: i32, %arg1: i32) -> (i32, i32) {
    %c0_i32 = arith.constant 0 : i32
    %c0_i32_0 = arith.constant 0 : i32
    return %arg1, %c0_i32 : i32, i32
  }
  func.func @transform_1(%arg0: i32, %arg1: i32) -> (i32, i32) {
    %c0_i32 = arith.constant 0 : i32
    %c0_i32_0 = arith.constant 0 : i32
    %c0_i32_1 = arith.constant 0 : i32
    return %c0_i32, %c0_i32_0 : i32, i32
  }
  func.func @transform_2(%arg0: i32, %arg1: i32) -> (i32, i32) {
    %c0_i32 = arith.constant 0 : i32
    %c0_i32_0 = arith.constant 0 : i32
    %c0_i32_1 = arith.constant 0 : i32
    return %c0_i32, %c0_i32_0 : i32, i32
  }
  func.func @transform_3(%arg0: i32, %arg1: i32) -> (i32, i32) {
    %c0_i32 = arith.constant 0 : i32
    %c0_i32_0 = arith.constant 0 : i32
    %c0_i32_1 = arith.constant 0 : i32
    return %c0_i32, %c0_i32_0 : i32, i32
  }
  func.func @transform_4(%arg0: i32, %arg1: i32) -> (i32, i32) {
    %c0_i32 = arith.constant 0 : i32
    %c0_i32_0 = arith.constant 0 : i32
    %c0_i32_1 = arith.constant 0 : i32
    return %c0_i32, %c0_i32_0 : i32, i32
  }
  func.func @transform_5(%arg0: i32, %arg1: i32) -> (i32, i32) {
    %c0_i32 = arith.constant 0 : i32
    %c0_i32_0 = arith.constant 0 : i32
    return %c0_i32, %arg0 : i32, i32
  }
  func.func @transform_6(%arg0: i32, %arg1: i32) -> (i32, i32) {
    %c0_i32 = arith.constant 0 : i32
    %c0_i32_0 = arith.constant 0 : i32
    return %c0_i32, %arg0 : i32, i32
  }
  func.func @transform_7(%arg0: i32, %arg1: i32) -> (i32, i32) {
    %c0_i32 = arith.constant 0 : i32
    return %arg1, %arg0 : i32, i32
  }
}

</mosaic_0001>

<bundles_post_ra>
// kernel: decoder_forward.1
= control target key start
LH: loop header
LB: loop body
LE: loop exit
PB: predicated region body
PF: predicated region fallthrough
CT: control target
= control target key end

     0   :  { %12 = vsyncpa [#allocation3], 0  ;;  %s819_s0 = inlined_call_operand.vmem [shape: f32[8,128], index: 0, kind: input, shape index: {}]   ;;  %s820_s1 = inlined_call_operand.hbm [shape: bf16[128,128], index: 1, kind: input, shape index: {}]   ;;  %s821_s2 = inlined_call_operand.vmem [shape: f32[1,128], index: 2, kind: input, shape index: {}]   ;;  %s822_s3 = inlined_call_operand.hbm [shape: bf16[128,128], index: 3, kind: input, shape index: {}]   ;;  %s823_s4 = inlined_call_operand.vmem [shape: f32[1,128], index: 4, kind: input, shape index: {}]   ;;  %s824_s5 = inlined_call_operand.hbm [shape: bf16[128,128], index: 5, kind: input, shape index: {}]   ;;  %s825_s6 = inlined_call_operand.vmem [shape: f32[1,128], index: 6, kind: input, shape index: {}]   ;;  %s826_s7 = inlined_call_operand.hbm [shape: f32[8,128], index: 7, kind: output, shape index: {}]  }
   0x1   :  { %13 = vsyncpa [#allocation6], 0 }
   0x2   :  { %14 = vsyncpa [#allocation4], 0  ;;  %s665_s24 = smov [#allocation5]   ;;  %s666_s26 = smov [#allocation2]  }
   0x3   :  { %s36_s25 = sshll.u32 %s665_s24, 4  ;;  %s22_s27 = sshll.u32 %s666_s26, 4  ;;  %s37_s25 = int_to_ptr.vmem [resolvable:$true] %s36_s25  ;;  %s713_s27 = int_to_ptr.vmem [resolvable:$true] %s22_s27 }
   0x4   :  { %s571_s30 = scalar_lea.hbm %s822_s3, 1024 }
   0x5   :  { %p572_p0 = scmp.ne.s32.totalorder %s822_s3, %s571_s30  ;;  %p575_p1 = scmp.lt.u32.totalorder %s571_s30, %s822_s3 }
   0x7   :  { %p577_p2 = pnand %p575_p1, %p572_p0 }
   0x9   :  { %580 = shalt.err (!%p577_p2)
}
   0xa   :  { %s581_s12 = scalar_lea.vmem %s37_s25, 1024  ;;  %p586_p4 = scmp.lt.s32.totalorder %s37_s25, %s37_s25 }
   0xb   :  { %p582_p3 = scmp.ne.s32.totalorder %s37_s25, %s581_s12  ;;  %p587_p5 = scmp.lt.s32.totalorder %s581_s12, %s581_s12 }
   0xd   :  { %p588_p6 = por %p587_p5, %p586_p4 }
   0xf   :  { %p589_p7 = pnand %p588_p6, %p582_p3 }
  0x11   :  { %592 = shalt.err (!%p589_p7)
}
  0x12   :  { %s667_s13 = smov 64   ;;  %s668_s14 = smov 4  }
  0x13   :  { %42 = dma.hbm_to_vmem [thread:$0]  %s822_s3, 1024, %s37_s25, [#allocation6], %s667_s13, %s667_s13, %s668_s14  }
  0x14   :  { %s593_s19 = scalar_lea.hbm %s820_s1, 1024 }
  0x15   :  { %p594_p8 = scmp.ne.s32.totalorder %s820_s1, %s593_s19  ;;  %p597_p9 = scmp.lt.u32.totalorder %s593_s19, %s820_s1 }
  0x17   :  { %p599_p10 = pnand %p597_p9, %p594_p8 }
  0x19   :  { %602 = shalt.err (!%p599_p10)
}
  0x1a   :  { %s603_s24 = scalar_lea.vmem %s713_s27, 1024  ;;  %p608_p12 = scmp.lt.s32.totalorder %s713_s27, %s713_s27 }
  0x1b   :  { %p604_p11 = scmp.ne.s32.totalorder %s713_s27, %s603_s24  ;;  %p609_p13 = scmp.lt.s32.totalorder %s603_s24, %s603_s24 }
  0x1d   :  { %p610_p0 = por %p609_p13, %p608_p12 }
  0x1f   :  { %p611_p1 = pnand %p610_p0, %p604_p11 }
  0x21   :  { %614 = shalt.err (!%p611_p1)
}
  0x22   :  { %28 = dma.hbm_to_vmem [thread:$0]  %s820_s1, 1024, %s713_s27, [#allocation3], %s667_s13, %s667_s13, %s668_s14  }
  0x23   :  { %s669_s26 = smov [#allocation7]   ;;  %s615_s8 = scalar_lea.hbm %s824_s5, 1024 }
  0x24   :  { %s50_s28 = sshll.u32 %s669_s26, 4  ;;  %p616_p2 = scmp.ne.s32.totalorder %s824_s5, %s615_s8  ;;  %s51_s28 = int_to_ptr.vmem [resolvable:$true] %s50_s28 }
  0x25   :  { %p619_p3 = scmp.lt.u32.totalorder %s615_s8, %s824_s5 }
  0x27   :  { %p621_p4 = pnand %p619_p3, %p616_p2 }
  0x29   :  { %624 = shalt.err (!%p621_p4)
}
  0x2a   :  { %s625_s15 = scalar_lea.vmem %s51_s28, 1024  ;;  %p630_p6 = scmp.lt.s32.totalorder %s51_s28, %s51_s28 }
  0x2b   :  { %p626_p5 = scmp.ne.s32.totalorder %s51_s28, %s625_s15  ;;  %p631_p7 = scmp.lt.s32.totalorder %s625_s15, %s625_s15 }
  0x2d   :  { %p632_p8 = por %p631_p7, %p630_p6 }
  0x2f   :  { %p633_p9 = pnand %p632_p8, %p626_p5 }
  0x31   :  { %636 = shalt.err (!%p633_p9)
}
  0x32   :  { %56 = dma.hbm_to_vmem [thread:$0]  %s824_s5, 1024, %s51_s28, [#allocation6], %s667_s13, %s667_s13, %s668_s14  }
  0x33   :  { %659 = dma.done.wait [#allocation3], 1024  }
  0x34   :  { %660 = vsyncadd [#allocation3], 4294966272 }
  0x35   :  { %661 = dma.done.wait [#allocation6], 2048  }
  0x36   :  { %662 = vsyncadd [#allocation6], 4294965248  ;;  %v670_v0 = vmov 0.0   ;;  %vm671_vm0 = vmmov 0   ;;  %v547_v1 = vld [vmem:[#allocation2] sm:$0xff]   ;;  %v548_v2 = vld [vmem:[#allocation2 + $0x8] sm:$0xff]  }
  0x37   :  { %479 = vmatprep.subr.bf16.mxu0 %v670_v0  ;;  %495 = vmatprep.mubr.msk.bf16.mxu0 %vm671_vm0, %v670_v0  ;;  %v549_v3 = vld [vmem:[#allocation2 + $0x10] sm:$0xff]   ;;  %v555_v4 = vld [vmem:[#allocation5] sm:$0xff]   ;;  %v550_v5 = vld [vmem:[#allocation2 + $0x18] sm:$0xff]   ;;  %s672_s19 = smov [#allocation8]  }
  0x38   :  { %499 = vmatprep.subr.bf16.mxu1 %v670_v0  ;;  %515 = vmatprep.mubr.msk.bf16.mxu1 %vm671_vm0, %v670_v0  ;;  %v556_v6 = vld [vmem:[#allocation5 + $0x8] sm:$0xff]   ;;  %v551_v7 = vld [vmem:[#allocation2 + $0x20] sm:$0xff]   ;;  %v557_v8 = vld [vmem:[#allocation5 + $0x10] sm:$0xff]   ;;  %s415_s20 = sshll.u32 %s672_s19, 4  ;;  %s416_s20 = int_to_ptr.vmem [resolvable:$true] %s415_s20 }
  0x39   :  { %480 = vmatpush3.bf16.msra.mxu0 %v547_v1  ;;  %500 = vmatpush3.bf16.msra.mxu1 %v555_v4  ;;  %v552_v9 = vld [vmem:[#allocation2 + $0x28] sm:$0xff]   ;;  %v558_v10 = vld [vmem:[#allocation5 + $0x18] sm:$0xff]   ;;  %v553_v11 = vld [vmem:[#allocation2 + $0x30] sm:$0xff]   ;;  %p642_p11 = scmp.lt.s32.totalorder %s416_s20, %s416_s20 }
  0x3a   :  { %481 = vmatprep.subr.bf16.mxu0 %v670_v0  ;;  %501 = vmatprep.subr.bf16.mxu1 %v670_v0  ;;  %v559_v12 = vld [vmem:[#allocation5 + $0x20] sm:$0xff]   ;;  %v554_v13 = vld [vmem:[#allocation2 + $0x38] sm:$0xff]   ;;  %v560_v15 = vld [vmem:[#allocation5 + $0x28] sm:$0xff]  }
  0x3b   :  { %v69_v14 = vld [vmem:[%s819_s0] sm:$0xff]  ;;  %v561_v17 = vld [vmem:[#allocation5 + $0x30] sm:$0xff]   ;;  %v562_v18 = vld [vmem:[#allocation5 + $0x38] sm:$0xff]  }
  0x3c   :  { %v87_v16 = vpack.c.bf16 %v69_v14, %v69_v14  ;;  %v563_v19 = vld [vmem:[#allocation7] sm:$0xff]   ;;  %v564_v20 = vld [vmem:[#allocation7 + $0x8] sm:$0xff]   ;;  %v565_v21 = vld [vmem:[#allocation7 + $0x10] sm:$0xff]  }
  0x3d   :  { %482 = vmatpush3.bf16.msra.mxu0 %v548_v2  ;;  %502 = vmatpush3.bf16.msra.mxu1 %v556_v6  ;;  %v566_v22 = vld [vmem:[#allocation7 + $0x18] sm:$0xff]   ;;  %v567_v23 = vld [vmem:[#allocation7 + $0x20] sm:$0xff]   ;;  %v568_v24 = vld [vmem:[#allocation7 + $0x28] sm:$0xff]  }
  0x3e   :  { %483 = vmatprep.subr.bf16.mxu0 %v670_v0  ;;  %503 = vmatprep.subr.bf16.mxu1 %v670_v0  ;;  %v425_v25 = vld [vmem:[%s821_s2] ss:$0 sm:$0xff]  ;;  %v569_v33 = vld [vmem:[#allocation7 + $0x30] sm:$0xff]   ;;  %v570_v34 = vld [vmem:[#allocation7 + $0x38] sm:$0xff]  }
  0x3f   :  { %v434_v35 = vld [vmem:[%s823_s4] ss:$0 sm:$0xff]  ;;  %s637_s4 = scalar_lea.vmem %s416_s20, 128 }
  0x40   :  { %v443_v43 = vld [vmem:[%s825_s6] ss:$0 sm:$0xff]  ;;  %p638_p10 = scmp.ne.s32.totalorder %s416_s20, %s637_s4  ;;  %p643_p12 = scmp.lt.s32.totalorder %s637_s4, %s637_s4 }
  0x41   :  { %484 = vmatpush3.bf16.msra.mxu0 %v549_v3  ;;  %504 = vmatpush3.bf16.msra.mxu1 %v557_v8 }
  0x42   :  { %485 = vmatprep.subr.bf16.mxu0 %v670_v0  ;;  %505 = vmatprep.subr.bf16.mxu1 %v670_v0  ;;  %p644_p13 = por %p643_p12, %p642_p11 }
  0x44   :  { %p645_p0 = pnand %p644_p13, %p638_p10 }
  0x45   :  { %486 = vmatpush3.bf16.msra.mxu0 %v550_v5  ;;  %506 = vmatpush3.bf16.msra.mxu1 %v558_v10 }
  0x46   :  { %487 = vmatprep.subr.bf16.mxu0 %v670_v0  ;;  %507 = vmatprep.subr.bf16.mxu1 %v670_v0 }
  0x49   :  { %488 = vmatpush3.bf16.msra.mxu0 %v551_v7  ;;  %508 = vmatpush3.bf16.msra.mxu1 %v559_v12 }
  0x4a   :  { %489 = vmatprep.subr.bf16.mxu0 %v670_v0  ;;  %509 = vmatprep.subr.bf16.mxu1 %v670_v0 }
  0x4d   :  { %490 = vmatpush3.bf16.msra.mxu0 %v552_v9  ;;  %510 = vmatpush3.bf16.msra.mxu1 %v560_v15 }
  0x4e   :  { %491 = vmatprep.subr.bf16.mxu0 %v670_v0  ;;  %511 = vmatprep.subr.bf16.mxu1 %v670_v0 }
  0x51   :  { %492 = vmatpush3.bf16.msra.mxu0 %v553_v11  ;;  %512 = vmatpush3.bf16.msra.mxu1 %v561_v17 }
  0x52   :  { %493 = vmatprep.subr.bf16.mxu0 %v670_v0  ;;  %513 = vmatprep.subr.bf16.mxu1 %v670_v0 }
  0x55   :  { %494 = vmatpush3.bf16.msra.mxu0 %v554_v13  ;;  %514 = vmatpush3.bf16.msra.mxu1 %v562_v18 }
  0x56   :  { %519 = vmatprep.subr.bf16.mxu0 %v670_v0 }
  0x58   :  { %496 = vmatmul.mubr.bf16.vlgmr.msra.gmra.mrb[0].mxu0 %v87_v16 }
  0x59   :  { %535 = vmatprep.mubr.msk.bf16.mxu0 %vm671_vm0, %v670_v0  ;;  %520 = vmatpush3.bf16.msra.mxu0 %v563_v19 }
  0x5a   :  { %521 = vmatprep.subr.bf16.mxu0 %v670_v0 }
  0x5d   :  { %522 = vmatpush3.bf16.msra.mxu0 %v564_v20 }
  0x5e   :  { %523 = vmatprep.subr.bf16.mxu0 %v670_v0 }
  0x61   :  { %524 = vmatpush3.bf16.msra.mxu0 %v565_v21 }
  0x62   :  { %525 = vmatprep.subr.bf16.mxu0 %v670_v0 }
  0x65   :  { %526 = vmatpush3.bf16.msra.mxu0 %v566_v22 }
  0x66   :  { %527 = vmatprep.subr.bf16.mxu0 %v670_v0 }
  0x69   :  { %528 = vmatpush3.bf16.msra.mxu0 %v567_v23 }
  0x6a   :  { %529 = vmatprep.subr.bf16.mxu0 %v670_v0 }
  0x6d   :  { %530 = vmatpush3.bf16.msra.mxu0 %v568_v24 }
  0x6e   :  { %531 = vmatprep.subr.bf16.mxu0 %v670_v0 }
  0x71   :  { %532 = vmatpush3.bf16.msra.mxu0 %v569_v33 }
  0x72   :  { %533 = vmatprep.subr.bf16.mxu0 %v670_v0 }
  0x75   :  { %534 = vmatpush3.bf16.msra.mxu0 %v570_v34 }
 0x12b   :  { %v176_v26 = vpop.f32.mrb[0].mxu0 }
 0x12c   :  { %v177_v27 = vadd.f32 %v425_v25, %v176_v26  ;;  %v497_v28 = vpop.f32.mrb[1].mxu0 }
 0x12d   :  { %v179_v29 = vpop.f32.mrb[2].mxu0 }
 0x12e   :  { %v182_v30 = vmax.f32 %v177_v27, 0.0  ;;  %v498_v31 = vpop.f32.mrb[3].mxu0 }
 0x130   :  { %v200_v32 = vpack.c.bf16 %v182_v30, %v182_v30 }
 0x132   :  { %516 = vmatmul.mubr.bf16.vlgmr.msra.gmra.mrb[0].mxu1 %v200_v32 }
 0x205   :  { %v289_v36 = vpop.f32.mrb[0].mxu1 }
 0x206   :  { %v290_v37 = vadd.f32 %v434_v35, %v289_v36  ;;  %v517_v38 = vpop.f32.mrb[1].mxu1 }
 0x207   :  { %v292_v39 = vpop.f32.mrb[2].mxu1 }
 0x208   :  { %v295_v40 = vmax.f32 %v290_v37, 0.0  ;;  %v518_v41 = vpop.f32.mrb[3].mxu1 }
 0x20a   :  { %v313_v42 = vpack.c.bf16 %v295_v40, %v295_v40 }
 0x20c   :  { %536 = vmatmul.mubr.bf16.vlgmr.msra.gmra.mrb[4].mxu0 %v313_v42 }
 0x2df   :  { %v402_v44 = vpop.f32.mrb[4].mxu0 }
 0x2e0   :  { %v403_v45 = vadd.f32 %v443_v43, %v402_v44  ;;  %v537_v46 = vpop.f32.mrb[5].mxu0 }
 0x2e1   :  { %v405_v47 = vpop.f32.mrb[6].mxu0 }
 0x2e2   :  { %408 = vst [vmem:[#allocation8] sm:$0xff] %v403_v45  ;;  %v538_v48 = vpop.f32.mrb[7].mxu0 }
 0x2e3   :  { %648 = shalt.err (!%p645_p0)
}
 0x2e4   :  { %s649_s6 = scalar_lea.hbm %s826_s7, 128 }
 0x2e5   :  { %p650_p1 = scmp.ne.s32.totalorder %s826_s7, %s649_s6  ;;  %p653_p2 = scmp.lt.u32.totalorder %s649_s6, %s826_s7 }
 0x2e7   :  { %p655_p3 = pnand %p653_p2, %p650_p1 }
 0x2e9   :  { %658 = shalt.err (!%p655_p3)
}
 0x2ea   :  { %418 = dma.vmem_to_hbm [thread:$0]  %s416_s20, 128, %s826_s7, [#allocation4]  }
 0x2eb   :  { %663 = dma.done.wait [#allocation4], 128  }
 0x2ec   :  { %664 = vsyncadd [#allocation4], 4294967168 }
 0x2ed   :  { %422 = vsyncpa [#allocation3], 1 }
 0x2ee   :  { %423 = vsyncpa [#allocation6], 1 }
 0x2ef   :  { %424 = vsyncpa [#allocation4], 1 }

// kernel: decoder_forward.1
= control target key start
LH: loop header
LB: loop body
LE: loop exit
PB: predicated region body
PF: predicated region fallthrough
CT: control target
= control target key end

     0   :  { %12 = vsyncpa [#allocation3], 0  ;;  %s819_s0 = inlined_call_operand.vmem [shape: f32[8,128], index: 0, kind: input, shape index: {}]   ;;  %s820_s1 = inlined_call_operand.hbm [shape: bf16[128,128], index: 1, kind: input, shape index: {}]   ;;  %s821_s2 = inlined_call_operand.vmem [shape: f32[1,128], index: 2, kind: input, shape index: {}]   ;;  %s822_s3 = inlined_call_operand.hbm [shape: bf16[128,128], index: 3, kind: input, shape index: {}]   ;;  %s823_s4 = inlined_call_operand.vmem [shape: f32[1,128], index: 4, kind: input, shape index: {}]   ;;  %s824_s5 = inlined_call_operand.hbm [shape: bf16[128,128], index: 5, kind: input, shape index: {}]   ;;  %s825_s6 = inlined_call_operand.vmem [shape: f32[1,128], index: 6, kind: input, shape index: {}]   ;;  %s826_s7 = inlined_call_operand.hbm [shape: f32[8,128], index: 7, kind: output, shape index: {}]  }
   0x1   :  { %13 = vsyncpa [#allocation6], 0 }
   0x2   :  { %14 = vsyncpa [#allocation4], 0  ;;  %s665_s24 = smov [#allocation5]   ;;  %s666_s26 = smov [#allocation2]  }
   0x3   :  { %s36_s25 = sshll.u32 %s665_s24, 4  ;;  %s22_s27 = sshll.u32 %s666_s26, 4  ;;  %s37_s25 = int_to_ptr.vmem [resolvable:$true] %s36_s25  ;;  %s713_s27 = int_to_ptr.vmem [resolvable:$true] %s22_s27 }
   0x4   :  { %s571_s30 = scalar_lea.hbm %s822_s3, 1024 }
   0x5   :  { %p572_p0 = scmp.ne.s32.totalorder %s822_s3, %s571_s30  ;;  %p575_p1 = scmp.lt.u32.totalorder %s571_s30, %s822_s3 }
   0x7   :  { %p577_p2 = pnand %p575_p1, %p572_p0 }
   0x9   :  { %580 = shalt.err (!%p577_p2)
}
   0xa   :  { %s581_s12 = scalar_lea.vmem %s37_s25, 1024  ;;  %p586_p4 = scmp.lt.s32.totalorder %s37_s25, %s37_s25 }
   0xb   :  { %p582_p3 = scmp.ne.s32.totalorder %s37_s25, %s581_s12  ;;  %p587_p5 = scmp.lt.s32.totalorder %s581_s12, %s581_s12 }
   0xd   :  { %p588_p6 = por %p587_p5, %p586_p4 }
   0xf   :  { %p589_p7 = pnand %p588_p6, %p582_p3 }
  0x11   :  { %592 = shalt.err (!%p589_p7)
}
  0x12   :  { %s667_s13 = smov 64   ;;  %s668_s14 = smov 4  }
  0x13   :  { %42 = dma.hbm_to_vmem [thread:$0]  %s822_s3, 1024, %s37_s25, [#allocation6], %s667_s13, %s667_s13, %s668_s14  }
  0x14   :  { %s593_s19 = scalar_lea.hbm %s820_s1, 1024 }
  0x15   :  { %p594_p8 = scmp.ne.s32.totalorder %s820_s1, %s593_s19  ;;  %p597_p9 = scmp.lt.u32.totalorder %s593_s19, %s820_s1 }
  0x17   :  { %p599_p10 = pnand %p597_p9, %p594_p8 }
  0x19   :  { %602 = shalt.err (!%p599_p10)
}
  0x1a   :  { %s603_s24 = scalar_lea.vmem %s713_s27, 1024  ;;  %p608_p12 = scmp.lt.s32.totalorder %s713_s27, %s713_s27 }
  0x1b   :  { %p604_p11 = scmp.ne.s32.totalorder %s713_s27, %s603_s24  ;;  %p609_p13 = scmp.lt.s32.totalorder %s603_s24, %s603_s24 }
  0x1d   :  { %p610_p0 = por %p609_p13, %p608_p12 }
  0x1f   :  { %p611_p1 = pnand %p610_p0, %p604_p11 }
  0x21   :  { %614 = shalt.err (!%p611_p1)
}
  0x22   :  { %28 = dma.hbm_to_vmem [thread:$0]  %s820_s1, 1024, %s713_s27, [#allocation3], %s667_s13, %s667_s13, %s668_s14  }
  0x23   :  { %s669_s26 = smov [#allocation7]   ;;  %s615_s8 = scalar_lea.hbm %s824_s5, 1024 }
  0x24   :  { %s50_s28 = sshll.u32 %s669_s26, 4  ;;  %p616_p2 = scmp.ne.s32.totalorder %s824_s5, %s615_s8  ;;  %s51_s28 = int_to_ptr.vmem [resolvable:$true] %s50_s28 }
  0x25   :  { %p619_p3 = scmp.lt.u32.totalorder %s615_s8, %s824_s5 }
  0x27   :  { %p621_p4 = pnand %p619_p3, %p616_p2 }
  0x29   :  { %624 = shalt.err (!%p621_p4)
}
  0x2a   :  { %s625_s15 = scalar_lea.vmem %s51_s28, 1024  ;;  %p630_p6 = scmp.lt.s32.totalorder %s51_s28, %s51_s28 }
  0x2b   :  { %p626_p5 = scmp.ne.s32.totalorder %s51_s28, %s625_s15  ;;  %p631_p7 = scmp.lt.s32.totalorder %s625_s15, %s625_s15 }
  0x2d   :  { %p632_p8 = por %p631_p7, %p630_p6 }
  0x2f   :  { %p633_p9 = pnand %p632_p8, %p626_p5 }
  0x31   :  { %636 = shalt.err (!%p633_p9)
}
  0x32   :  { %56 = dma.hbm_to_vmem [thread:$0]  %s824_s5, 1024, %s51_s28, [#allocation6], %s667_s13, %s667_s13, %s668_s14  }
  0x33   :  { %659 = dma.done.wait [#allocation3], 1024  }
  0x34   :  { %660 = vsyncadd [#allocation3], 4294966272 }
  0x35   :  { %661 = dma.done.wait [#allocation6], 2048  }
  0x36   :  { %662 = vsyncadd [#allocation6], 4294965248  ;;  %v670_v0 = vmov 0.0   ;;  %vm671_vm0 = vmmov 0   ;;  %v547_v1 = vld [vmem:[#allocation2] sm:$0xff]   ;;  %v548_v2 = vld [vmem:[#allocation2 + $0x8] sm:$0xff]  }
  0x37   :  { %479 = vmatprep.subr.bf16.mxu0 %v670_v0  ;;  %495 = vmatprep.mubr.msk.bf16.mxu0 %vm671_vm0, %v670_v0  ;;  %v549_v3 = vld [vmem:[#allocation2 + $0x10] sm:$0xff]   ;;  %v555_v4 = vld [vmem:[#allocation5] sm:$0xff]   ;;  %v550_v5 = vld [vmem:[#allocation2 + $0x18] sm:$0xff]   ;;  %s672_s19 = smov [#allocation8]  }
  0x38   :  { %499 = vmatprep.subr.bf16.mxu1 %v670_v0  ;;  %515 = vmatprep.mubr.msk.bf16.mxu1 %vm671_vm0, %v670_v0  ;;  %v556_v6 = vld [vmem:[#allocation5 + $0x8] sm:$0xff]   ;;  %v551_v7 = vld [vmem:[#allocation2 + $0x20] sm:$0xff]   ;;  %v557_v8 = vld [vmem:[#allocation5 + $0x10] sm:$0xff]   ;;  %s415_s20 = sshll.u32 %s672_s19, 4  ;;  %s416_s20 = int_to_ptr.vmem [resolvable:$true] %s415_s20 }
  0x39   :  { %480 = vmatpush3.bf16.msra.mxu0 %v547_v1  ;;  %500 = vmatpush3.bf16.msra.mxu1 %v555_v4  ;;  %v552_v9 = vld [vmem:[#allocation2 + $0x28] sm:$0xff]   ;;  %v558_v10 = vld [vmem:[#allocation5 + $0x18] sm:$0xff]   ;;  %v553_v11 = vld [vmem:[#allocation2 + $0x30] sm:$0xff]   ;;  %p642_p11 = scmp.lt.s32.totalorder %s416_s20, %s416_s20 }
  0x3a   :  { %481 = vmatprep.subr.bf16.mxu0 %v670_v0  ;;  %501 = vmatprep.subr.bf16.mxu1 %v670_v0  ;;  %v559_v12 = vld [vmem:[#allocation5 + $0x20] sm:$0xff]   ;;  %v554_v13 = vld [vmem:[#allocation2 + $0x38] sm:$0xff]   ;;  %v560_v15 = vld [vmem:[#allocation5 + $0x28] sm:$0xff]  }
  0x3b   :  { %v69_v14 = vld [vmem:[%s819_s0] sm:$0xff]  ;;  %v561_v17 = vld [vmem:[#allocation5 + $0x30] sm:$0xff]   ;;  %v562_v18 = vld [vmem:[#allocation5 + $0x38] sm:$0xff]  }
  0x3c   :  { %v87_v16 = vpack.c.bf16 %v69_v14, %v69_v14  ;;  %v563_v19 = vld [vmem:[#allocation7] sm:$0xff]   ;;  %v564_v20 = vld [vmem:[#allocation7 + $0x8] sm:$0xff]   ;;  %v565_v21 = vld [vmem:[#allocation7 + $0x10] sm:$0xff]  }
  0x3d   :  { %482 = vmatpush3.bf16.msra.mxu0 %v548_v2  ;;  %502 = vmatpush3.bf16.msra.mxu1 %v556_v6  ;;  %v566_v22 = vld [vmem:[#allocation7 + $0x18] sm:$0xff]   ;;  %v567_v23 = vld [vmem:[#allocation7 + $0x20] sm:$0xff]   ;;  %v568_v24 = vld [vmem:[#allocation7 + $0x28] sm:$0xff]  }
  0x3e   :  { %483 = vmatprep.subr.bf16.mxu0 %v670_v0  ;;  %503 = vmatprep.subr.bf16.mxu1 %v670_v0  ;;  %v425_v25 = vld [vmem:[%s821_s2] ss:$0 sm:$0xff]  ;;  %v569_v33 = vld [vmem:[#allocation7 + $0x30] sm:$0xff]   ;;  %v570_v34 = vld [vmem:[#allocation7 + $0x38] sm:$0xff]  }
  0x3f   :  { %v434_v35 = vld [vmem:[%s823_s4] ss:$0 sm:$0xff]  ;;  %s637_s4 = scalar_lea.vmem %s416_s20, 128 }
  0x40   :  { %v443_v43 = vld [vmem:[%s825_s6] ss:$0 sm:$0xff]  ;;  %p638_p10 = scmp.ne.s32.totalorder %s416_s20, %s637_s4  ;;  %p643_p12 = scmp.lt.s32.totalorder %s637_s4, %s637_s4 }
  0x41   :  { %484 = vmatpush3.bf16.msra.mxu0 %v549_v3  ;;  %504 = vmatpush3.bf16.msra.mxu1 %v557_v8 }
  0x42   :  { %485 = vmatprep.subr.bf16.mxu0 %v670_v0  ;;  %505 = vmatprep.subr.bf16.mxu1 %v670_v0  ;;  %p644_p13 = por %p643_p12, %p642_p11 }
  0x44   :  { %p645_p0 = pnand %p644_p13, %p638_p10 }
  0x45   :  { %486 = vmatpush3.bf16.msra.mxu0 %v550_v5  ;;  %506 = vmatpush3.bf16.msra.mxu1 %v558_v10 }
  0x46   :  { %487 = vmatprep.subr.bf16.mxu0 %v670_v0  ;;  %507 = vmatprep.subr.bf16.mxu1 %v670_v0 }
  0x49   :  { %488 = vmatpush3.bf16.msra.mxu0 %v551_v7  ;;  %508 = vmatpush3.bf16.msra.mxu1 %v559_v12 }
  0x4a   :  { %489 = vmatprep.subr.bf16.mxu0 %v670_v0  ;;  %509 = vmatprep.subr.bf16.mxu1 %v670_v0 }
  0x4d   :  { %490 = vmatpush3.bf16.msra.mxu0 %v552_v9  ;;  %510 = vmatpush3.bf16.msra.mxu1 %v560_v15 }
  0x4e   :  { %491 = vmatprep.subr.bf16.mxu0 %v670_v0  ;;  %511 = vmatprep.subr.bf16.mxu1 %v670_v0 }
  0x51   :  { %492 = vmatpush3.bf16.msra.mxu0 %v553_v11  ;;  %512 = vmatpush3.bf16.msra.mxu1 %v561_v17 }
  0x52   :  { %493 = vmatprep.subr.bf16.mxu0 %v670_v0  ;;  %513 = vmatprep.subr.bf16.mxu1 %v670_v0 }
  0x55   :  { %494 = vmatpush3.bf16.msra.mxu0 %v554_v13  ;;  %514 = vmatpush3.bf16.msra.mxu1 %v562_v18 }
  0x56   :  { %519 = vmatprep.subr.bf16.mxu0 %v670_v0 }
  0x58   :  { %496 = vmatmul.mubr.bf16.vlgmr.msra.gmra.mrb[0].mxu0 %v87_v16 }
  0x59   :  { %535 = vmatprep.mubr.msk.bf16.mxu0 %vm671_vm0, %v670_v0  ;;  %520 = vmatpush3.bf16.msra.mxu0 %v563_v19 }
  0x5a   :  { %521 = vmatprep.subr.bf16.mxu0 %v670_v0 }
  0x5d   :  { %522 = vmatpush3.bf16.msra.mxu0 %v564_v20 }
  0x5e   :  { %523 = vmatprep.subr.bf16.mxu0 %v670_v0 }
  0x61   :  { %524 = vmatpush3.bf16.msra.mxu0 %v565_v21 }
  0x62   :  { %525 = vmatprep.subr.bf16.mxu0 %v670_v0 }
  0x65   :  { %526 = vmatpush3.bf16.msra.mxu0 %v566_v22 }
  0x66   :  { %527 = vmatprep.subr.bf16.mxu0 %v670_v0 }
  0x69   :  { %528 = vmatpush3.bf16.msra.mxu0 %v567_v23 }
  0x6a   :  { %529 = vmatprep.subr.bf16.mxu0 %v670_v0 }
  0x6d   :  { %530 = vmatpush3.bf16.msra.mxu0 %v568_v24 }
  0x6e   :  { %531 = vmatprep.subr.bf16.mxu0 %v670_v0 }
  0x71   :  { %532 = vmatpush3.bf16.msra.mxu0 %v569_v33 }
  0x72   :  { %533 = vmatprep.subr.bf16.mxu0 %v670_v0 }
  0x75   :  { %534 = vmatpush3.bf16.msra.mxu0 %v570_v34 }
 0x12b   :  { %v176_v26 = vpop.f32.mrb[0].mxu0 }
 0x12c   :  { %v177_v27 = vadd.f32 %v425_v25, %v176_v26  ;;  %v497_v28 = vpop.f32.mrb[1].mxu0 }
 0x12d   :  { %v179_v29 = vpop.f32.mrb[2].mxu0 }
 0x12e   :  { %v182_v30 = vmax.f32 %v177_v27, 0.0  ;;  %v498_v31 = vpop.f32.mrb[3].mxu0 }
 0x130   :  { %v200_v32 = vpack.c.bf16 %v182_v30, %v182_v30 }
 0x132   :  { %516 = vmatmul.mubr.bf16.vlgmr.msra.gmra.mrb[0].mxu1 %v200_v32 }
 0x205   :  { %v289_v36 = vpop.f32.mrb[0].mxu1 }
 0x206   :  { %v290_v37 = vadd.f32 %v434_v35, %v289_v36  ;;  %v517_v38 = vpop.f32.mrb[1].mxu1 }
 0x207   :  { %v292_v39 = vpop.f32.mrb[2].mxu1 }
 0x208   :  { %v295_v40 = vmax.f32 %v290_v37, 0.0  ;;  %v518_v41 = vpop.f32.mrb[3].mxu1 }
 0x20a   :  { %v313_v42 = vpack.c.bf16 %v295_v40, %v295_v40 }
 0x20c   :  { %536 = vmatmul.mubr.bf16.vlgmr.msra.gmra.mrb[4].mxu0 %v313_v42 }
 0x2df   :  { %v402_v44 = vpop.f32.mrb[4].mxu0 }
 0x2e0   :  { %v403_v45 = vadd.f32 %v443_v43, %v402_v44  ;;  %v537_v46 = vpop.f32.mrb[5].mxu0 }
 0x2e1   :  { %v405_v47 = vpop.f32.mrb[6].mxu0 }
 0x2e2   :  { %408 = vst [vmem:[#allocation8] sm:$0xff] %v403_v45  ;;  %v538_v48 = vpop.f32.mrb[7].mxu0 }
 0x2e3   :  { %648 = shalt.err (!%p645_p0)
}
 0x2e4   :  { %s649_s6 = scalar_lea.hbm %s826_s7, 128 }
 0x2e5   :  { %p650_p1 = scmp.ne.s32.totalorder %s826_s7, %s649_s6  ;;  %p653_p2 = scmp.lt.u32.totalorder %s649_s6, %s826_s7 }
 0x2e7   :  { %p655_p3 = pnand %p653_p2, %p650_p1 }
 0x2e9   :  { %658 = shalt.err (!%p655_p3)
}
 0x2ea   :  { %418 = dma.vmem_to_hbm [thread:$0]  %s416_s20, 128, %s826_s7, [#allocation4]  }
 0x2eb   :  { %663 = dma.done.wait [#allocation4], 128  }
 0x2ec   :  { %664 = vsyncadd [#allocation4], 4294967168 }
 0x2ed   :  { %422 = vsyncpa [#allocation3], 1 }
 0x2ee   :  { %423 = vsyncpa [#allocation6], 1 }
 0x2ef   :  { %424 = vsyncpa [#allocation4], 1 }

</bundles_post_ra>
